<compile_context>
chip_gen: v5e
topology: v5e:2x2
jax: 0.10.0
libtpu: 0.0.40
codegen_flags: <defaults>
</compile_context>

<pallas_src>
import jax
import jax.numpy as jnp
from jax.experimental import pallas as pl
from jax.experimental.pallas import tpu as pltpu

_BN_EPS = 1e-5
_PAD = 128          # lane-dense width every layer is padded to
_IN_DIM = 120
_OUT_DIM = 120

# encoder: 120->60->30->10->3, decoder: 3->10->30->60->120.
# Every layer except the final decoder Linear is followed by BatchNorm1d + Tanh.
_LAYER_DIMS = [(120, 60), (60, 30), (30, 10), (10, 3),
               (3, 10), (10, 30), (30, 60), (60, 120)]
_N_LAYERS = len(_LAYER_DIMS)
_N_BN = _N_LAYERS - 1  # first 7 layers have BatchNorm + Tanh


def _ae_fused_kernel(x_ref, w_ref, b_ref, gamma_ref, beta_ref, out_ref, xbuf):
    """Fully-unrolled 8x (Linear [+ BN + Tanh]) for one BN batch.

    x_ref:     (B, 120)         raw input batch, f32
    w_ref:     (8, 128, 128)    per-layer weights (in, out), zero-padded, bf16
    b_ref:     (8, 1, 128)      per-layer biases, zero-padded, f32
    gamma_ref: (7, 1, 128)      BN gammas (layers 0..6), zero-padded, f32
    beta_ref:  (7, 1, 128)      BN betas  (layers 0..6), zero-padded, f32
    out_ref:   (B, 120)         final Linear output, f32
    xbuf:      (B, 128)         VMEM scratch: lane-dense padded activation
    """
    batch = x_ref.shape[0]
    inv_b = 1.0 / batch  # Python constant

    # Zero-pad the (B,120) input to a lane-dense (B,128) working tile in VMEM.
    # Padded lanes stay exactly 0 through every layer (zero weight rows/cols,
    # zero bias/beta, gamma=0 on padded lanes => BN output 0, tanh(0)=0).
    xbuf[...] = jnp.zeros_like(xbuf)
    xbuf[:, :_IN_DIM] = x_ref[...]
    h = xbuf[...]  # (B, 128) f32, stays resident in vregs/VMEM across layers

    for i in range(_N_LAYERS):  # static unroll: 8 small MXU pushes
        y = jnp.dot(h.astype(jnp.bfloat16), w_ref[i],
                    preferred_element_type=jnp.float32) + b_ref[i]
        if i < _N_BN:
            # BatchNorm1d (training mode), single-sweep batch statistics.
            s1 = jnp.sum(y, axis=0, keepdims=True)          # (1, 128)
            s2 = jnp.sum(y * y, axis=0, keepdims=True)      # (1, 128)
            mean = s1 * inv_b
            var = jnp.maximum(s2 * inv_b - mean * mean, 0.0)
            # Folded affine: y_hat = y * scale + shift
            scale = gamma_ref[i] * jax.lax.rsqrt(var + _BN_EPS)
            shift = beta_ref[i] - mean * scale
            h = jnp.tanh(y * scale + shift)
        else:
            h = y  # final decoder Linear: no BN / Tanh
    out_ref[...] = h[:, :_OUT_DIM]


@jax.jit
def _ae_fused_call(x3, w_packed, b_packed, gamma_packed, beta_packed):
    """x3: (G, B, 120) — G independent BN batches, one fused pallas_call."""
    g_dim, batch, feat = x3.shape
    assert feat == _IN_DIM, feat

    flops = 2 * g_dim * batch * _PAD * _PAD * _N_LAYERS
    transcendentals = _N_BN * g_dim * batch * _PAD
    bytes_accessed = (w_packed.size * w_packed.dtype.itemsize
                      + 4 * (b_packed.size + gamma_packed.size + beta_packed.size)
                      + 4 * g_dim * batch * (_IN_DIM + _OUT_DIM))

    grid_spec = pltpu.PrefetchScalarGridSpec(
        num_scalar_prefetch=0,
        grid=(g_dim,),
        in_specs=[
            # one full BN batch per grid step
            pl.BlockSpec((None, batch, _IN_DIM), lambda g: (g, 0, 0)),
            # parameters: constant index map -> DMA'd once, VMEM-resident
            pl.BlockSpec((_N_LAYERS, _PAD, _PAD), lambda g: (0, 0, 0)),
            pl.BlockSpec((_N_LAYERS, 1, _PAD), lambda g: (0, 0, 0)),
            pl.BlockSpec((_N_BN, 1, _PAD), lambda g: (0, 0, 0)),
            pl.BlockSpec((_N_BN, 1, _PAD), lambda g: (0, 0, 0)),
        ],
        out_specs=pl.BlockSpec((None, batch, _OUT_DIM), lambda g: (g, 0, 0)),
        scratch_shapes=[pltpu.VMEM((batch, _PAD), jnp.float32)],
    )
    return pl.pallas_call(
        _ae_fused_kernel,
        out_shape=jax.ShapeDtypeStruct((g_dim, batch, _OUT_DIM), jnp.float32),
        grid_spec=grid_spec,
        compiler_params=pltpu.CompilerParams(
            dimension_semantics=("parallel",),      # v7x: shard BN batches across TCs
            vmem_limit_bytes=32 * 1024 * 1024,      # raise v5e's 16 MiB default
        ),
        cost_estimate=pl.CostEstimate(
            flops=flops,
            transcendentals=transcendentals,
            bytes_accessed=bytes_accessed,
        ),
    )(x3, w_packed, b_packed, gamma_packed, beta_packed)


def init_params(key):
    """PyTorch nn.Linear default init; pack + zero-pad to lane-dense slabs.

    Weights are stored as a single bf16 (8,128,128) slab (f32 accumulate in the
    kernel); bias / gamma / beta stay f32.
    """
    w_packed = jnp.zeros((_N_LAYERS, _PAD, _PAD), jnp.float32)
    b_packed = jnp.zeros((_N_LAYERS, 1, _PAD), jnp.float32)
    gamma_packed = jnp.zeros((_N_BN, 1, _PAD), jnp.float32)
    beta_packed = jnp.zeros((_N_BN, 1, _PAD), jnp.float32)
    for i, (din, dout) in enumerate(_LAYER_DIMS):
        key, kw, kb = jax.random.split(key, 3)
        bound = 1.0 / (din ** 0.5)
        w = jax.random.uniform(kw, (din, dout), jnp.float32, -bound, bound)
        bias = jax.random.uniform(kb, (dout,), jnp.float32, -bound, bound)
        w_packed = w_packed.at[i, :din, :dout].set(w)
        b_packed = b_packed.at[i, 0, :dout].set(bias)
        if i < _N_BN:
            gamma_packed = gamma_packed.at[i, 0, :dout].set(1.0)
            # beta stays zero (PyTorch default)
    return dict(w=w_packed.astype(jnp.bfloat16), b=b_packed,
                gamma=gamma_packed, beta=beta_packed)


def ae_forward(params, x):
    """x: (B, 120) — one BN batch (matches the PyTorch module's forward)."""
    out = _ae_fused_call(x[None], params["w"], params["b"],
                         params["gamma"], params["beta"])[0]
    return {"output": out}


def ae_forward_batched(params, x_groups):
    """x_groups: (G, B, 120) — G independent BN batches fused into one launch,
    weights DMA'd once and kept VMEM-resident across the grid."""
    out = _ae_fused_call(x_groups, params["w"], params["b"],
                         params["gamma"], params["beta"])
    return {"output": out}


def compute_loss(outputs, target):
    return jnp.mean((outputs["output"] - target) ** 2)


def compute_batch_error(outputs, target):
    return jnp.mean((outputs["output"] - target) ** 2, axis=1)


if __name__ == "__main__":
    key = jax.random.PRNGKey(0)
    k_params, k_x = jax.random.split(key)

    params = init_params(k_params)

    batch = 8  # one sublane tile; BN stats are over exactly these rows
    x = jax.random.normal(k_x, (batch, 120), dtype=jnp.float32)

    outputs = ae_forward(params, x)
    out = jax.block_until_ready(outputs["output"])
    assert out.shape == (batch, 120), out.shape

    # multi-batch path: 4 independent BN batches, single pallas_call with a grid
    x_groups = jax.random.normal(k_x, (4, batch, 120), dtype=jnp.float32)
    out_g = jax.block_until_ready(ae_forward_batched(params, x_groups)["output"])
    assert out_g.shape == (4, batch, 120), out_g.shape

    # exercise the loss helpers too (plain JAX glue)
    loss = jax.block_until_ready(compute_loss(outputs, x))
    berr = jax.block_until_ready(compute_batch_error(outputs, x))
    assert berr.shape == (batch,)

    print("KERNEL_OK")
</pallas_src>

<mosaic_0001>
module attributes {stable_mosaic.version = 11 : i64} {
  func.func @_ae_fused_kernel(%arg0: i32, %arg1: memref<1x8x120xf32, #tpu.memory_space<vmem>>, %arg2: memref<8x128x128xbf16, #tpu.memory_space<vmem>>, %arg3: memref<8x1x128xf32, #tpu.memory_space<vmem>>, %arg4: memref<7x1x128xf32, #tpu.memory_space<vmem>>, %arg5: memref<7x1x128xf32, #tpu.memory_space<vmem>>, %arg6: memref<1x8x120xf32, #tpu.memory_space<vmem>>, %arg7: memref<8x128xf32, #tpu.memory_space<vmem>>) attributes {dimension_semantics = [#tpu.dimension_semantics<parallel>], iteration_bounds = array<i64: 1>, scalar_prefetch = 0 : i64, scratch_operands = 1 : i64, tpu.core_type = #tpu.core_type<tc>, window_params = [{transform_indices = @transform_0, window_bounds = array<i64: 1, 8, 120>}, {pipeline_mode = #tpu.pipeline_mode<synchronous>, transform_indices = @transform_1, window_bounds = array<i64: 8, 128, 128>}, {pipeline_mode = #tpu.pipeline_mode<synchronous>, transform_indices = @transform_2, window_bounds = array<i64: 8, 1, 128>}, {pipeline_mode = #tpu.pipeline_mode<synchronous>, transform_indices = @transform_3, window_bounds = array<i64: 7, 1, 128>}, {pipeline_mode = #tpu.pipeline_mode<synchronous>, transform_indices = @transform_4, window_bounds = array<i64: 7, 1, 128>}, {transform_indices = @transform_5, window_bounds = array<i64: 1, 8, 120>}]} {
    %cst = arith.constant 0.000000e+00 : f32
    %0 = vector.broadcast %cst : f32 to vector<8x128xf32>
    %c0 = arith.constant 0 : index
    %c0_0 = arith.constant 0 : index
    %1 = vector.load %arg7[%c0, %c0_0] : memref<8x128xf32, #tpu.memory_space<vmem>>, vector<8x128xf32>
    tpu.vector_store %arg7[%c0, %c0_0], %0 {strides = array<i32>} : memref<8x128xf32, #tpu.memory_space<vmem>>, vector<8x128xf32>,
    %c0_1 = arith.constant 0 : index
    %c0_2 = arith.constant 0 : index
    %c0_3 = arith.constant 0 : index
    %2 = vector.load %arg1[%c0_1, %c0_2, %c0_3] : memref<1x8x120xf32, #tpu.memory_space<vmem>>, vector<1x8x120xf32>
    %3 = vector.shape_cast %2 : vector<1x8x120xf32> to vector<8x120xf32>
    %c0_4 = arith.constant 0 : index
    %c0_5 = arith.constant 0 : index
    %4 = vector.load %arg7[%c0_4, %c0_5] : memref<8x128xf32, #tpu.memory_space<vmem>>, vector<8x120xf32>
    tpu.vector_store %arg7[%c0_4, %c0_5], %3 {strides = array<i32>} : memref<8x128xf32, #tpu.memory_space<vmem>>, vector<8x120xf32>,
    %c0_6 = arith.constant 0 : index
    %c0_7 = arith.constant 0 : index
    %5 = vector.load %arg7[%c0_6, %c0_7] : memref<8x128xf32, #tpu.memory_space<vmem>>, vector<8x128xf32>
    %6 = arith.truncf %5 : vector<8x128xf32> to vector<8x128xbf16>
    %c0_8 = arith.constant 0 : index
    %c0_9 = arith.constant 0 : index
    %c0_10 = arith.constant 0 : index
    %7 = vector.load %arg2[%c0_8, %c0_9, %c0_10] : memref<8x128x128xbf16, #tpu.memory_space<vmem>>, vector<1x128x128xbf16>
    %8 = vector.shape_cast %7 : vector<1x128x128xbf16> to vector<128x128xbf16>
    %cst_11 = arith.constant dense<0.000000e+00> : vector<8x128xf32>
    %9 = tpu.matmul %6, %8, %cst_11 {dimension_numbers = #tpu.dot_dimension_numbers<[1], [0], [0], [1], [0, 0, 1, 1], [], []>} : vector<8x128xbf16>, vector<128x128xbf16>, vector<8x128xf32> -> vector<8x128xf32>
    %c0_12 = arith.constant 0 : index
    %c0_13 = arith.constant 0 : index
    %c0_14 = arith.constant 0 : index
    %10 = vector.load %arg3[%c0_12, %c0_13, %c0_14] : memref<8x1x128xf32, #tpu.memory_space<vmem>>, vector<1x1x128xf32>
    %11 = vector.shape_cast %10 : vector<1x1x128xf32> to vector<1x128xf32>
    %12 = vector.broadcast %11 : vector<1x128xf32> to vector<8x128xf32>
    %13 = arith.addf %9, %12 : vector<8x128xf32>
    %cst_15 = arith.constant dense<0.000000e+00> : vector<128xf32>
    %14 = vector.multi_reduction <add>, %13, %cst_15 [0] : vector<8x128xf32> to vector<128xf32>
    %15 = vector.shape_cast %14 : vector<128xf32> to vector<1x128xf32>
    %16 = arith.mulf %13, %13 : vector<8x128xf32>
    %cst_16 = arith.constant dense<0.000000e+00> : vector<128xf32>
    %17 = vector.multi_reduction <add>, %16, %cst_16 [0] : vector<8x128xf32> to vector<128xf32>
    %18 = vector.shape_cast %17 : vector<128xf32> to vector<1x128xf32>
    %cst_17 = arith.constant 1.250000e-01 : f32
    %19 = vector.broadcast %cst_17 : f32 to vector<1x128xf32>
    %20 = arith.mulf %15, %19 : vector<1x128xf32>
    %cst_18 = arith.constant 1.250000e-01 : f32
    %21 = vector.broadcast %cst_18 : f32 to vector<1x128xf32>
    %22 = arith.mulf %18, %21 : vector<1x128xf32>
    %23 = arith.mulf %20, %20 : vector<1x128xf32>
    %24 = arith.subf %22, %23 : vector<1x128xf32>
    %cst_19 = arith.constant 0.000000e+00 : f32
    %25 = vector.broadcast %cst_19 : f32 to vector<1x128xf32>
    %26 = arith.maximumf %24, %25 : vector<1x128xf32>
    %c0_20 = arith.constant 0 : index
    %c0_21 = arith.constant 0 : index
    %c0_22 = arith.constant 0 : index
    %27 = vector.load %arg4[%c0_20, %c0_21, %c0_22] : memref<7x1x128xf32, #tpu.memory_space<vmem>>, vector<1x1x128xf32>
    %28 = vector.shape_cast %27 : vector<1x1x128xf32> to vector<1x128xf32>
    %cst_23 = arith.constant 9.99999974E-6 : f32
    %29 = vector.broadcast %cst_23 : f32 to vector<1x128xf32>
    %30 = arith.addf %26, %29 : vector<1x128xf32>
    %31 = math.rsqrt %30 : vector<1x128xf32>
    %32 = arith.mulf %28, %31 : vector<1x128xf32>
    %c0_24 = arith.constant 0 : index
    %c0_25 = arith.constant 0 : index
    %c0_26 = arith.constant 0 : index
    %33 = vector.load %arg5[%c0_24, %c0_25, %c0_26] : memref<7x1x128xf32, #tpu.memory_space<vmem>>, vector<1x1x128xf32>
    %34 = vector.shape_cast %33 : vector<1x1x128xf32> to vector<1x128xf32>
    %35 = arith.mulf %20, %32 : vector<1x128xf32>
    %36 = arith.subf %34, %35 : vector<1x128xf32>
    %37 = vector.broadcast %32 : vector<1x128xf32> to vector<8x128xf32>
    %38 = arith.mulf %13, %37 : vector<8x128xf32>
    %39 = vector.broadcast %36 : vector<1x128xf32> to vector<8x128xf32>
    %40 = arith.addf %38, %39 : vector<8x128xf32>
    %41 = math.tanh %40 : vector<8x128xf32>
    %42 = arith.truncf %41 : vector<8x128xf32> to vector<8x128xbf16>
    %c1 = arith.constant 1 : index
    %c0_27 = arith.constant 0 : index
    %c0_28 = arith.constant 0 : index
    %43 = vector.load %arg2[%c1, %c0_27, %c0_28] : memref<8x128x128xbf16, #tpu.memory_space<vmem>>, vector<1x128x128xbf16>
    %44 = vector.shape_cast %43 : vector<1x128x128xbf16> to vector<128x128xbf16>
    %cst_29 = arith.constant dense<0.000000e+00> : vector<8x128xf32>
    %45 = tpu.matmul %42, %44, %cst_29 {dimension_numbers = #tpu.dot_dimension_numbers<[1], [0], [0], [1], [0, 0, 1, 1], [], []>} : vector<8x128xbf16>, vector<128x128xbf16>, vector<8x128xf32> -> vector<8x128xf32>
    %c1_30 = arith.constant 1 : index
    %c0_31 = arith.constant 0 : index
    %c0_32 = arith.constant 0 : index
    %46 = vector.load %arg3[%c1_30, %c0_31, %c0_32] : memref<8x1x128xf32, #tpu.memory_space<vmem>>, vector<1x1x128xf32>
    %47 = vector.shape_cast %46 : vector<1x1x128xf32> to vector<1x128xf32>
    %48 = vector.broadcast %47 : vector<1x128xf32> to vector<8x128xf32>
    %49 = arith.addf %45, %48 : vector<8x128xf32>
    %cst_33 = arith.constant dense<0.000000e+00> : vector<128xf32>
    %50 = vector.multi_reduction <add>, %49, %cst_33 [0] : vector<8x128xf32> to vector<128xf32>
    %51 = vector.shape_cast %50 : vector<128xf32> to vector<1x128xf32>
    %52 = arith.mulf %49, %49 : vector<8x128xf32>
    %cst_34 = arith.constant dense<0.000000e+00> : vector<128xf32>
    %53 = vector.multi_reduction <add>, %52, %cst_34 [0] : vector<8x128xf32> to vector<128xf32>
    %54 = vector.shape_cast %53 : vector<128xf32> to vector<1x128xf32>
    %cst_35 = arith.constant 1.250000e-01 : f32
    %55 = vector.broadcast %cst_35 : f32 to vector<1x128xf32>
    %56 = arith.mulf %51, %55 : vector<1x128xf32>
    %cst_36 = arith.constant 1.250000e-01 : f32
    %57 = vector.broadcast %cst_36 : f32 to vector<1x128xf32>
    %58 = arith.mulf %54, %57 : vector<1x128xf32>
    %59 = arith.mulf %56, %56 : vector<1x128xf32>
    %60 = arith.subf %58, %59 : vector<1x128xf32>
    %cst_37 = arith.constant 0.000000e+00 : f32
    %61 = vector.broadcast %cst_37 : f32 to vector<1x128xf32>
    %62 = arith.maximumf %60, %61 : vector<1x128xf32>
    %c1_38 = arith.constant 1 : index
    %c0_39 = arith.constant 0 : index
    %c0_40 = arith.constant 0 : index
    %63 = vector.load %arg4[%c1_38, %c0_39, %c0_40] : memref<7x1x128xf32, #tpu.memory_space<vmem>>, vector<1x1x128xf32>
    %64 = vector.shape_cast %63 : vector<1x1x128xf32> to vector<1x128xf32>
    %cst_41 = arith.constant 9.99999974E-6 : f32
    %65 = vector.broadcast %cst_41 : f32 to vector<1x128xf32>
    %66 = arith.addf %62, %65 : vector<1x128xf32>
    %67 = math.rsqrt %66 : vector<1x128xf32>
    %68 = arith.mulf %64, %67 : vector<1x128xf32>
    %c1_42 = arith.constant 1 : index
    %c0_43 = arith.constant 0 : index
    %c0_44 = arith.constant 0 : index
    %69 = vector.load %arg5[%c1_42, %c0_43, %c0_44] : memref<7x1x128xf32, #tpu.memory_space<vmem>>, vector<1x1x128xf32>
    %70 = vector.shape_cast %69 : vector<1x1x128xf32> to vector<1x128xf32>
    %71 = arith.mulf %56, %68 : vector<1x128xf32>
    %72 = arith.subf %70, %71 : vector<1x128xf32>
    %73 = vector.broadcast %68 : vector<1x128xf32> to vector<8x128xf32>
    %74 = arith.mulf %49, %73 : vector<8x128xf32>
    %75 = vector.broadcast %72 : vector<1x128xf32> to vector<8x128xf32>
    %76 = arith.addf %74, %75 : vector<8x128xf32>
    %77 = math.tanh %76 : vector<8x128xf32>
    %78 = arith.truncf %77 : vector<8x128xf32> to vector<8x128xbf16>
    %c2 = arith.constant 2 : index
    %c0_45 = arith.constant 0 : index
    %c0_46 = arith.constant 0 : index
    %79 = vector.load %arg2[%c2, %c0_45, %c0_46] : memref<8x128x128xbf16, #tpu.memory_space<vmem>>, vector<1x128x128xbf16>
    %80 = vector.shape_cast %79 : vector<1x128x128xbf16> to vector<128x128xbf16>
    %cst_47 = arith.constant dense<0.000000e+00> : vector<8x128xf32>
    %81 = tpu.matmul %78, %80, %cst_47 {dimension_numbers = #tpu.dot_dimension_numbers<[1], [0], [0], [1], [0, 0, 1, 1], [], []>} : vector<8x128xbf16>, vector<128x128xbf16>, vector<8x128xf32> -> vector<8x128xf32>
    %c2_48 = arith.constant 2 : index
    %c0_49 = arith.constant 0 : index
    %c0_50 = arith.constant 0 : index
    %82 = vector.load %arg3[%c2_48, %c0_49, %c0_50] : memref<8x1x128xf32, #tpu.memory_space<vmem>>, vector<1x1x128xf32>
    %83 = vector.shape_cast %82 : vector<1x1x128xf32> to vector<1x128xf32>
    %84 = vector.broadcast %83 : vector<1x128xf32> to vector<8x128xf32>
    %85 = arith.addf %81, %84 : vector<8x128xf32>
    %cst_51 = arith.constant dense<0.000000e+00> : vector<128xf32>
    %86 = vector.multi_reduction <add>, %85, %cst_51 [0] : vector<8x128xf32> to vector<128xf32>
    %87 = vector.shape_cast %86 : vector<128xf32> to vector<1x128xf32>
    %88 = arith.mulf %85, %85 : vector<8x128xf32>
    %cst_52 = arith.constant dense<0.000000e+00> : vector<128xf32>
    %89 = vector.multi_reduction <add>, %88, %cst_52 [0] : vector<8x128xf32> to vector<128xf32>
    %90 = vector.shape_cast %89 : vector<128xf32> to vector<1x128xf32>
    %cst_53 = arith.constant 1.250000e-01 : f32
    %91 = vector.broadcast %cst_53 : f32 to vector<1x128xf32>
    %92 = arith.mulf %87, %91 : vector<1x128xf32>
    %cst_54 = arith.constant 1.250000e-01 : f32
    %93 = vector.broadcast %cst_54 : f32 to vector<1x128xf32>
    %94 = arith.mulf %90, %93 : vector<1x128xf32>
    %95 = arith.mulf %92, %92 : vector<1x128xf32>
    %96 = arith.subf %94, %95 : vector<1x128xf32>
    %cst_55 = arith.constant 0.000000e+00 : f32
    %97 = vector.broadcast %cst_55 : f32 to vector<1x128xf32>
    %98 = arith.maximumf %96, %97 : vector<1x128xf32>
    %c2_56 = arith.constant 2 : index
    %c0_57 = arith.constant 0 : index
    %c0_58 = arith.constant 0 : index
    %99 = vector.load %arg4[%c2_56, %c0_57, %c0_58] : memref<7x1x128xf32, #tpu.memory_space<vmem>>, vector<1x1x128xf32>
    %100 = vector.shape_cast %99 : vector<1x1x128xf32> to vector<1x128xf32>
    %cst_59 = arith.constant 9.99999974E-6 : f32
    %101 = vector.broadcast %cst_59 : f32 to vector<1x128xf32>
    %102 = arith.addf %98, %101 : vector<1x128xf32>
    %103 = math.rsqrt %102 : vector<1x128xf32>
    %104 = arith.mulf %100, %103 : vector<1x128xf32>
    %c2_60 = arith.constant 2 : index
    %c0_61 = arith.constant 0 : index
    %c0_62 = arith.constant 0 : index
    %105 = vector.load %arg5[%c2_60, %c0_61, %c0_62] : memref<7x1x128xf32, #tpu.memory_space<vmem>>, vector<1x1x128xf32>
    %106 = vector.shape_cast %105 : vector<1x1x128xf32> to vector<1x128xf32>
    %107 = arith.mulf %92, %104 : vector<1x128xf32>
    %108 = arith.subf %106, %107 : vector<1x128xf32>
    %109 = vector.broadcast %104 : vector<1x128xf32> to vector<8x128xf32>
    %110 = arith.mulf %85, %109 : vector<8x128xf32>
    %111 = vector.broadcast %108 : vector<1x128xf32> to vector<8x128xf32>
    %112 = arith.addf %110, %111 : vector<8x128xf32>
    %113 = math.tanh %112 : vector<8x128xf32>
    %114 = arith.truncf %113 : vector<8x128xf32> to vector<8x128xbf16>
    %c3 = arith.constant 3 : index
    %c0_63 = arith.constant 0 : index
    %c0_64 = arith.constant 0 : index
    %115 = vector.load %arg2[%c3, %c0_63, %c0_64] : memref<8x128x128xbf16, #tpu.memory_space<vmem>>, vector<1x128x128xbf16>
    %116 = vector.shape_cast %115 : vector<1x128x128xbf16> to vector<128x128xbf16>
    %cst_65 = arith.constant dense<0.000000e+00> : vector<8x128xf32>
    %117 = tpu.matmul %114, %116, %cst_65 {dimension_numbers = #tpu.dot_dimension_numbers<[1], [0], [0], [1], [0, 0, 1, 1], [], []>} : vector<8x128xbf16>, vector<128x128xbf16>, vector<8x128xf32> -> vector<8x128xf32>
    %c3_66 = arith.constant 3 : index
    %c0_67 = arith.constant 0 : index
    %c0_68 = arith.constant 0 : index
    %118 = vector.load %arg3[%c3_66, %c0_67, %c0_68] : memref<8x1x128xf32, #tpu.memory_space<vmem>>, vector<1x1x128xf32>
    %119 = vector.shape_cast %118 : vector<1x1x128xf32> to vector<1x128xf32>
    %120 = vector.broadcast %119 : vector<1x128xf32> to vector<8x128xf32>
    %121 = arith.addf %117, %120 : vector<8x128xf32>
    %cst_69 = arith.constant dense<0.000000e+00> : vector<128xf32>
    %122 = vector.multi_reduction <add>, %121, %cst_69 [0] : vector<8x128xf32> to vector<128xf32>
    %123 = vector.shape_cast %122 : vector<128xf32> to vector<1x128xf32>
    %124 = arith.mulf %121, %121 : vector<8x128xf32>
    %cst_70 = arith.constant dense<0.000000e+00> : vector<128xf32>
    %125 = vector.multi_reduction <add>, %124, %cst_70 [0] : vector<8x128xf32> to vector<128xf32>
    %126 = vector.shape_cast %125 : vector<128xf32> to vector<1x128xf32>
    %cst_71 = arith.constant 1.250000e-01 : f32
    %127 = vector.broadcast %cst_71 : f32 to vector<1x128xf32>
    %128 = arith.mulf %123, %127 : vector<1x128xf32>
    %cst_72 = arith.constant 1.250000e-01 : f32
    %129 = vector.broadcast %cst_72 : f32 to vector<1x128xf32>
    %130 = arith.mulf %126, %129 : vector<1x128xf32>
    %131 = arith.mulf %128, %128 : vector<1x128xf32>
    %132 = arith.subf %130, %131 : vector<1x128xf32>
    %cst_73 = arith.constant 0.000000e+00 : f32
    %133 = vector.broadcast %cst_73 : f32 to vector<1x128xf32>
    %134 = arith.maximumf %132, %133 : vector<1x128xf32>
    %c3_74 = arith.constant 3 : index
    %c0_75 = arith.constant 0 : index
    %c0_76 = arith.constant 0 : index
    %135 = vector.load %arg4[%c3_74, %c0_75, %c0_76] : memref<7x1x128xf32, #tpu.memory_space<vmem>>, vector<1x1x128xf32>
    %136 = vector.shape_cast %135 : vector<1x1x128xf32> to vector<1x128xf32>
    %cst_77 = arith.constant 9.99999974E-6 : f32
    %137 = vector.broadcast %cst_77 : f32 to vector<1x128xf32>
    %138 = arith.addf %134, %137 : vector<1x128xf32>
    %139 = math.rsqrt %138 : vector<1x128xf32>
    %140 = arith.mulf %136, %139 : vector<1x128xf32>
    %c3_78 = arith.constant 3 : index
    %c0_79 = arith.constant 0 : index
    %c0_80 = arith.constant 0 : index
    %141 = vector.load %arg5[%c3_78, %c0_79, %c0_80] : memref<7x1x128xf32, #tpu.memory_space<vmem>>, vector<1x1x128xf32>
    %142 = vector.shape_cast %141 : vector<1x1x128xf32> to vector<1x128xf32>
    %143 = arith.mulf %128, %140 : vector<1x128xf32>
    %144 = arith.subf %142, %143 : vector<1x128xf32>
    %145 = vector.broadcast %140 : vector<1x128xf32> to vector<8x128xf32>
    %146 = arith.mulf %121, %145 : vector<8x128xf32>
    %147 = vector.broadcast %144 : vector<1x128xf32> to vector<8x128xf32>
    %148 = arith.addf %146, %147 : vector<8x128xf32>
    %149 = math.tanh %148 : vector<8x128xf32>
    %150 = arith.truncf %149 : vector<8x128xf32> to vector<8x128xbf16>
    %c4 = arith.constant 4 : index
    %c0_81 = arith.constant 0 : index
    %c0_82 = arith.constant 0 : index
    %151 = vector.load %arg2[%c4, %c0_81, %c0_82] : memref<8x128x128xbf16, #tpu.memory_space<vmem>>, vector<1x128x128xbf16>
    %152 = vector.shape_cast %151 : vector<1x128x128xbf16> to vector<128x128xbf16>
    %cst_83 = arith.constant dense<0.000000e+00> : vector<8x128xf32>
    %153 = tpu.matmul %150, %152, %cst_83 {dimension_numbers = #tpu.dot_dimension_numbers<[1], [0], [0], [1], [0, 0, 1, 1], [], []>} : vector<8x128xbf16>, vector<128x128xbf16>, vector<8x128xf32> -> vector<8x128xf32>
    %c4_84 = arith.constant 4 : index
    %c0_85 = arith.constant 0 : index
    %c0_86 = arith.constant 0 : index
    %154 = vector.load %arg3[%c4_84, %c0_85, %c0_86] : memref<8x1x128xf32, #tpu.memory_space<vmem>>, vector<1x1x128xf32>
    %155 = vector.shape_cast %154 : vector<1x1x128xf32> to vector<1x128xf32>
    %156 = vector.broadcast %155 : vector<1x128xf32> to vector<8x128xf32>
    %157 = arith.addf %153, %156 : vector<8x128xf32>
    %cst_87 = arith.constant dense<0.000000e+00> : vector<128xf32>
    %158 = vector.multi_reduction <add>, %157, %cst_87 [0] : vector<8x128xf32> to vector<128xf32>
    %159 = vector.shape_cast %158 : vector<128xf32> to vector<1x128xf32>
    %160 = arith.mulf %157, %157 : vector<8x128xf32>
    %cst_88 = arith.constant dense<0.000000e+00> : vector<128xf32>
    %161 = vector.multi_reduction <add>, %160, %cst_88 [0] : vector<8x128xf32> to vector<128xf32>
    %162 = vector.shape_cast %161 : vector<128xf32> to vector<1x128xf32>
    %cst_89 = arith.constant 1.250000e-01 : f32
    %163 = vector.broadcast %cst_89 : f32 to vector<1x128xf32>
    %164 = arith.mulf %159, %163 : vector<1x128xf32>
    %cst_90 = arith.constant 1.250000e-01 : f32
    %165 = vector.broadcast %cst_90 : f32 to vector<1x128xf32>
    %166 = arith.mulf %162, %165 : vector<1x128xf32>
    %167 = arith.mulf %164, %164 : vector<1x128xf32>
    %168 = arith.subf %166, %167 : vector<1x128xf32>
    %cst_91 = arith.constant 0.000000e+00 : f32
    %169 = vector.broadcast %cst_91 : f32 to vector<1x128xf32>
    %170 = arith.maximumf %168, %169 : vector<1x128xf32>
    %c4_92 = arith.constant 4 : index
    %c0_93 = arith.constant 0 : index
    %c0_94 = arith.constant 0 : index
    %171 = vector.load %arg4[%c4_92, %c0_93, %c0_94] : memref<7x1x128xf32, #tpu.memory_space<vmem>>, vector<1x1x128xf32>
    %172 = vector.shape_cast %171 : vector<1x1x128xf32> to vector<1x128xf32>
    %cst_95 = arith.constant 9.99999974E-6 : f32
    %173 = vector.broadcast %cst_95 : f32 to vector<1x128xf32>
    %174 = arith.addf %170, %173 : vector<1x128xf32>
    %175 = math.rsqrt %174 : vector<1x128xf32>
    %176 = arith.mulf %172, %175 : vector<1x128xf32>
    %c4_96 = arith.constant 4 : index
    %c0_97 = arith.constant 0 : index
    %c0_98 = arith.constant 0 : index
    %177 = vector.load %arg5[%c4_96, %c0_97, %c0_98] : memref<7x1x128xf32, #tpu.memory_space<vmem>>, vector<1x1x128xf32>
    %178 = vector.shape_cast %177 : vector<1x1x128xf32> to vector<1x128xf32>
    %179 = arith.mulf %164, %176 : vector<1x128xf32>
    %180 = arith.subf %178, %179 : vector<1x128xf32>
    %181 = vector.broadcast %176 : vector<1x128xf32> to vector<8x128xf32>
    %182 = arith.mulf %157, %181 : vector<8x128xf32>
    %183 = vector.broadcast %180 : vector<1x128xf32> to vector<8x128xf32>
    %184 = arith.addf %182, %183 : vector<8x128xf32>
    %185 = math.tanh %184 : vector<8x128xf32>
    %186 = arith.truncf %185 : vector<8x128xf32> to vector<8x128xbf16>
    %c5 = arith.constant 5 : index
    %c0_99 = arith.constant 0 : index
    %c0_100 = arith.constant 0 : index
    %187 = vector.load %arg2[%c5, %c0_99, %c0_100] : memref<8x128x128xbf16, #tpu.memory_space<vmem>>, vector<1x128x128xbf16>
    %188 = vector.shape_cast %187 : vector<1x128x128xbf16> to vector<128x128xbf16>
    %cst_101 = arith.constant dense<0.000000e+00> : vector<8x128xf32>
    %189 = tpu.matmul %186, %188, %cst_101 {dimension_numbers = #tpu.dot_dimension_numbers<[1], [0], [0], [1], [0, 0, 1, 1], [], []>} : vector<8x128xbf16>, vector<128x128xbf16>, vector<8x128xf32> -> vector<8x128xf32>
    %c5_102 = arith.constant 5 : index
    %c0_103 = arith.constant 0 : index
    %c0_104 = arith.constant 0 : index
    %190 = vector.load %arg3[%c5_102, %c0_103, %c0_104] : memref<8x1x128xf32, #tpu.memory_space<vmem>>, vector<1x1x128xf32>
    %191 = vector.shape_cast %190 : vector<1x1x128xf32> to vector<1x128xf32>
    %192 = vector.broadcast %191 : vector<1x128xf32> to vector<8x128xf32>
    %193 = arith.addf %189, %192 : vector<8x128xf32>
    %cst_105 = arith.constant dense<0.000000e+00> : vector<128xf32>
    %194 = vector.multi_reduction <add>, %193, %cst_105 [0] : vector<8x128xf32> to vector<128xf32>
    %195 = vector.shape_cast %194 : vector<128xf32> to vector<1x128xf32>
    %196 = arith.mulf %193, %193 : vector<8x128xf32>
    %cst_106 = arith.constant dense<0.000000e+00> : vector<128xf32>
    %197 = vector.multi_reduction <add>, %196, %cst_106 [0] : vector<8x128xf32> to vector<128xf32>
    %198 = vector.shape_cast %197 : vector<128xf32> to vector<1x128xf32>
    %cst_107 = arith.constant 1.250000e-01 : f32
    %199 = vector.broadcast %cst_107 : f32 to vector<1x128xf32>
    %200 = arith.mulf %195, %199 : vector<1x128xf32>
    %cst_108 = arith.constant 1.250000e-01 : f32
    %201 = vector.broadcast %cst_108 : f32 to vector<1x128xf32>
    %202 = arith.mulf %198, %201 : vector<1x128xf32>
    %203 = arith.mulf %200, %200 : vector<1x128xf32>
    %204 = arith.subf %202, %203 : vector<1x128xf32>
    %cst_109 = arith.constant 0.000000e+00 : f32
    %205 = vector.broadcast %cst_109 : f32 to vector<1x128xf32>
    %206 = arith.maximumf %204, %205 : vector<1x128xf32>
    %c5_110 = arith.constant 5 : index
    %c0_111 = arith.constant 0 : index
    %c0_112 = arith.constant 0 : index
    %207 = vector.load %arg4[%c5_110, %c0_111, %c0_112] : memref<7x1x128xf32, #tpu.memory_space<vmem>>, vector<1x1x128xf32>
    %208 = vector.shape_cast %207 : vector<1x1x128xf32> to vector<1x128xf32>
    %cst_113 = arith.constant 9.99999974E-6 : f32
    %209 = vector.broadcast %cst_113 : f32 to vector<1x128xf32>
    %210 = arith.addf %206, %209 : vector<1x128xf32>
    %211 = math.rsqrt %210 : vector<1x128xf32>
    %212 = arith.mulf %208, %211 : vector<1x128xf32>
    %c5_114 = arith.constant 5 : index
    %c0_115 = arith.constant 0 : index
    %c0_116 = arith.constant 0 : index
    %213 = vector.load %arg5[%c5_114, %c0_115, %c0_116] : memref<7x1x128xf32, #tpu.memory_space<vmem>>, vector<1x1x128xf32>
    %214 = vector.shape_cast %213 : vector<1x1x128xf32> to vector<1x128xf32>
    %215 = arith.mulf %200, %212 : vector<1x128xf32>
    %216 = arith.subf %214, %215 : vector<1x128xf32>
    %217 = vector.broadcast %212 : vector<1x128xf32> to vector<8x128xf32>
    %218 = arith.mulf %193, %217 : vector<8x128xf32>
    %219 = vector.broadcast %216 : vector<1x128xf32> to vector<8x128xf32>
    %220 = arith.addf %218, %219 : vector<8x128xf32>
    %221 = math.tanh %220 : vector<8x128xf32>
    %222 = arith.truncf %221 : vector<8x128xf32> to vector<8x128xbf16>
    %c6 = arith.constant 6 : index
    %c0_117 = arith.constant 0 : index
    %c0_118 = arith.constant 0 : index
    %223 = vector.load %arg2[%c6, %c0_117, %c0_118] : memref<8x128x128xbf16, #tpu.memory_space<vmem>>, vector<1x128x128xbf16>
    %224 = vector.shape_cast %223 : vector<1x128x128xbf16> to vector<128x128xbf16>
    %cst_119 = arith.constant dense<0.000000e+00> : vector<8x128xf32>
    %225 = tpu.matmul %222, %224, %cst_119 {dimension_numbers = #tpu.dot_dimension_numbers<[1], [0], [0], [1], [0, 0, 1, 1], [], []>} : vector<8x128xbf16>, vector<128x128xbf16>, vector<8x128xf32> -> vector<8x128xf32>
    %c6_120 = arith.constant 6 : index
    %c0_121 = arith.constant 0 : index
    %c0_122 = arith.constant 0 : index
    %226 = vector.load %arg3[%c6_120, %c0_121, %c0_122] : memref<8x1x128xf32, #tpu.memory_space<vmem>>, vector<1x1x128xf32>
    %227 = vector.shape_cast %226 : vector<1x1x128xf32> to vector<1x128xf32>
    %228 = vector.broadcast %227 : vector<1x128xf32> to vector<8x128xf32>
    %229 = arith.addf %225, %228 : vector<8x128xf32>
    %cst_123 = arith.constant dense<0.000000e+00> : vector<128xf32>
    %230 = vector.multi_reduction <add>, %229, %cst_123 [0] : vector<8x128xf32> to vector<128xf32>
    %231 = vector.shape_cast %230 : vector<128xf32> to vector<1x128xf32>
    %232 = arith.mulf %229, %229 : vector<8x128xf32>
    %cst_124 = arith.constant dense<0.000000e+00> : vector<128xf32>
    %233 = vector.multi_reduction <add>, %232, %cst_124 [0] : vector<8x128xf32> to vector<128xf32>
    %234 = vector.shape_cast %233 : vector<128xf32> to vector<1x128xf32>
    %cst_125 = arith.constant 1.250000e-01 : f32
    %235 = vector.broadcast %cst_125 : f32 to vector<1x128xf32>
    %236 = arith.mulf %231, %235 : vector<1x128xf32>
    %cst_126 = arith.constant 1.250000e-01 : f32
    %237 = vector.broadcast %cst_126 : f32 to vector<1x128xf32>
    %238 = arith.mulf %234, %237 : vector<1x128xf32>
    %239 = arith.mulf %236, %236 : vector<1x128xf32>
    %240 = arith.subf %238, %239 : vector<1x128xf32>
    %cst_127 = arith.constant 0.000000e+00 : f32
    %241 = vector.broadcast %cst_127 : f32 to vector<1x128xf32>
    %242 = arith.maximumf %240, %241 : vector<1x128xf32>
    %c6_128 = arith.constant 6 : index
    %c0_129 = arith.constant 0 : index
    %c0_130 = arith.constant 0 : index
    %243 = vector.load %arg4[%c6_128, %c0_129, %c0_130] : memref<7x1x128xf32, #tpu.memory_space<vmem>>, vector<1x1x128xf32>
    %244 = vector.shape_cast %243 : vector<1x1x128xf32> to vector<1x128xf32>
    %cst_131 = arith.constant 9.99999974E-6 : f32
    %245 = vector.broadcast %cst_131 : f32 to vector<1x128xf32>
    %246 = arith.addf %242, %245 : vector<1x128xf32>
    %247 = math.rsqrt %246 : vector<1x128xf32>
    %248 = arith.mulf %244, %247 : vector<1x128xf32>
    %c6_132 = arith.constant 6 : index
    %c0_133 = arith.constant 0 : index
    %c0_134 = arith.constant 0 : index
    %249 = vector.load %arg5[%c6_132, %c0_133, %c0_134] : memref<7x1x128xf32, #tpu.memory_space<vmem>>, vector<1x1x128xf32>
    %250 = vector.shape_cast %249 : vector<1x1x128xf32> to vector<1x128xf32>
    %251 = arith.mulf %236, %248 : vector<1x128xf32>
    %252 = arith.subf %250, %251 : vector<1x128xf32>
    %253 = vector.broadcast %248 : vector<1x128xf32> to vector<8x128xf32>
    %254 = arith.mulf %229, %253 : vector<8x128xf32>
    %255 = vector.broadcast %252 : vector<1x128xf32> to vector<8x128xf32>
    %256 = arith.addf %254, %255 : vector<8x128xf32>
    %257 = math.tanh %256 : vector<8x128xf32>
    %258 = arith.truncf %257 : vector<8x128xf32> to vector<8x128xbf16>
    %c7 = arith.constant 7 : index
    %c0_135 = arith.constant 0 : index
    %c0_136 = arith.constant 0 : index
    %259 = vector.load %arg2[%c7, %c0_135, %c0_136] : memref<8x128x128xbf16, #tpu.memory_space<vmem>>, vector<1x128x128xbf16>
    %260 = vector.shape_cast %259 : vector<1x128x128xbf16> to vector<128x128xbf16>
    %cst_137 = arith.constant dense<0.000000e+00> : vector<8x128xf32>
    %261 = tpu.matmul %258, %260, %cst_137 {dimension_numbers = #tpu.dot_dimension_numbers<[1], [0], [0], [1], [0, 0, 1, 1], [], []>} : vector<8x128xbf16>, vector<128x128xbf16>, vector<8x128xf32> -> vector<8x128xf32>
    %c7_138 = arith.constant 7 : index
    %c0_139 = arith.constant 0 : index
    %c0_140 = arith.constant 0 : index
    %262 = vector.load %arg3[%c7_138, %c0_139, %c0_140] : memref<8x1x128xf32, #tpu.memory_space<vmem>>, vector<1x1x128xf32>
    %263 = vector.shape_cast %262 : vector<1x1x128xf32> to vector<1x128xf32>
    %264 = vector.broadcast %263 : vector<1x128xf32> to vector<8x128xf32>
    %265 = arith.addf %261, %264 : vector<8x128xf32>
    %266 = vector.extract_strided_slice %265 {offsets = [0, 0], sizes = [8, 120], strides = [1, 1]} : vector<8x128xf32> to vector<8x120xf32>
    %c0_141 = arith.constant 0 : index
    %c0_142 = arith.constant 0 : index
    %c0_143 = arith.constant 0 : index
    %267 = vector.load %arg6[%c0_141, %c0_142, %c0_143] : memref<1x8x120xf32, #tpu.memory_space<vmem>>, vector<1x8x120xf32>
    %268 = vector.shape_cast %267 : vector<1x8x120xf32> to vector<8x120xf32>
    %269 = vector.shape_cast %266 : vector<8x120xf32> to vector<1x8x120xf32>
    tpu.vector_store %arg6[%c0_141, %c0_142, %c0_143], %269 {strides = array<i32>} : memref<1x8x120xf32, #tpu.memory_space<vmem>>, vector<1x8x120xf32>,
    return
  }
  func.func @transform_0(%arg0: i32) -> (i32, i32, i32) {
    %c0_i32 = arith.constant 0 : i32
    %c0_i32_0 = arith.constant 0 : i32
    %c0_i32_1 = arith.constant 0 : i32
    return %arg0, %c0_i32, %c0_i32_0 : i32, i32, i32
  }
  func.func @transform_1(%arg0: i32) -> (i32, i32, i32) {
    %c0_i32 = arith.constant 0 : i32
    %c0_i32_0 = arith.constant 0 : i32
    %c0_i32_1 = arith.constant 0 : i32
    %c0_i32_2 = arith.constant 0 : i32
    return %c0_i32, %c0_i32_0, %c0_i32_1 : i32, i32, i32
  }
  func.func @transform_2(%arg0: i32) -> (i32, i32, i32) {
    %c0_i32 = arith.constant 0 : i32
    %c0_i32_0 = arith.constant 0 : i32
    %c0_i32_1 = arith.constant 0 : i32
    %c0_i32_2 = arith.constant 0 : i32
    return %c0_i32, %c0_i32_0, %c0_i32_1 : i32, i32, i32
  }
  func.func @transform_3(%arg0: i32) -> (i32, i32, i32) {
    %c0_i32 = arith.constant 0 : i32
    %c0_i32_0 = arith.constant 0 : i32
    %c0_i32_1 = arith.constant 0 : i32
    %c0_i32_2 = arith.constant 0 : i32
    return %c0_i32, %c0_i32_0, %c0_i32_1 : i32, i32, i32
  }
  func.func @transform_4(%arg0: i32) -> (i32, i32, i32) {
    %c0_i32 = arith.constant 0 : i32
    %c0_i32_0 = arith.constant 0 : i32
    %c0_i32_1 = arith.constant 0 : i32
    %c0_i32_2 = arith.constant 0 : i32
    return %c0_i32, %c0_i32_0, %c0_i32_1 : i32, i32, i32
  }
  func.func @transform_5(%arg0: i32) -> (i32, i32, i32) {
    %c0_i32 = arith.constant 0 : i32
    %c0_i32_0 = arith.constant 0 : i32
    %c0_i32_1 = arith.constant 0 : i32
    return %arg0, %c0_i32, %c0_i32_0 : i32, i32, i32
  }
}

</mosaic_0001>

<bundles_post_ra>
// kernel: _ae_fused_call.1
= control target key start
LH: loop header
LB: loop body
LE: loop exit
PB: predicated region body
PF: predicated region fallthrough
CT: control target
= control target key end

     0   :  { %10 = vsyncpa [#allocation4], 0  ;;  %s1685_s0 = inlined_call_operand.hbm [shape: f32[1,8,120], index: 0, kind: input, shape index: {}]   ;;  %s1686_s1 = inlined_call_operand.hbm [shape: bf16[8,128,128], index: 1, kind: input, shape index: {}]   ;;  %s1687_s2 = inlined_call_operand.hbm [shape: f32[8,1,128], index: 2, kind: input, shape index: {}]   ;;  %s1688_s3 = inlined_call_operand.hbm [shape: f32[7,1,128], index: 3, kind: input, shape index: {}]   ;;  %s1689_s4 = inlined_call_operand.hbm [shape: f32[7,1,128], index: 4, kind: input, shape index: {}]   ;;  %s1690_s5 = inlined_call_operand.hbm [shape: f32[1,8,120], index: 5, kind: output, shape index: {}]  }
   0x1   :  { %11 = vsyncpa [#allocation7], 0 }
   0x2   :  { %12 = vsyncpa [#allocation10], 0  ;;  %s29_s20 = sshll.u32 %s1686_s1, 4  ;;  %s30_s20 = int_to_ptr.hbm [resolvable:$true] %s29_s20 }
   0x3   :  { %13 = vsyncpa [#allocation5], 0  ;;  %s1624_s21 = smov [#allocation6]   ;;  %s1625_s23 = smov 64  }
   0x4   :  { %s31_s22 = sshll.u32 %s1624_s21, 4  ;;  %s1626_s24 = smov 4   ;;  %s32_s22 = int_to_ptr.vmem [resolvable:$true] %s31_s22 }
   0x5   :  { %37 = dma.hbm_to_vmem [thread:$0]  %s30_s20, 8192, %s32_s22, [#allocation7], %s1625_s23, %s1625_s23, %s1626_s24  }
   0x6   :  { %s55_s27 = sshll.u32 %s1688_s3, 4  ;;  %s1627_s28 = smov [#allocation9]   ;;  %s56_s27 = int_to_ptr.hbm [resolvable:$true] %s55_s27 }
   0x7   :  { %s57_s29 = sshll.u32 %s1627_s28, 4  ;;  %s19_s7 = sshll.u32 %s1685_s0, 4  ;;  %s58_s29 = int_to_ptr.vmem [resolvable:$true] %s57_s29  ;;  %s20_s7 = int_to_ptr.hbm [resolvable:$true] %s19_s7 }
   0x8   :  { %s1628_s1 = smov 16   ;;  %s1629_s8 = smov 1  }
   0x9   :  { %63 = dma.hbm_to_vmem [thread:$0]  %s56_s27, 112, %s58_s29, [#allocation10], %s1628_s1, %s1628_s1, %s1629_s8  }
   0xa   :  { %s42_s11 = sshll.u32 %s1687_s2, 4  ;;  %s1630_s12 = smov [#allocation3]   ;;  %s43_s11 = int_to_ptr.hbm [resolvable:$true] %s42_s11 }
   0xb   :  { %s21_s13 = sshll.u32 %s1630_s12, 4  ;;  %s1631_s3 = smov [#allocation8]   ;;  %s22_s13 = int_to_ptr.vmem [resolvable:$true] %s21_s13 }
   0xc   :  { %24 = dma.hbm_to_vmem [thread:$0]  %s20_s7, 128, %s22_s13, [#allocation4]  }
   0xd   :  { %s44_s14 = sshll.u32 %s1631_s3, 4  ;;  %s68_s0 = sshll.u32 %s1689_s4, 4  ;;  %s45_s14 = int_to_ptr.vmem [resolvable:$true] %s44_s14  ;;  %s69_s0 = int_to_ptr.hbm [resolvable:$true] %s68_s0 }
   0xe   :  { %50 = dma.hbm_to_vmem [thread:$0]  %s43_s11, 128, %s45_s14, [#allocation7], %s1628_s1, %s1628_s1, %s1629_s8  }
   0xf   :  { %s1632_s17 = smov [#allocation11]  }
  0x10   :  { %s70_s18 = sshll.u32 %s1632_s17, 4  ;;  %s71_s18 = int_to_ptr.vmem [resolvable:$true] %s70_s18 }
  0x11   :  { %76 = dma.hbm_to_vmem [thread:$0]  %s69_s0, 112, %s71_s18, [#allocation10], %s1628_s1, %s1628_s1, %s1629_s8  }
  0x12   :  { %1616 = dma.done.wait [#allocation4], 128  }
  0x13   :  { %1617 = vsyncadd [#allocation4], 4294967168 }
  0x14   :  { %1618 = dma.done.wait [#allocation7], 8320  }
  0x15   :  { %1619 = vsyncadd [#allocation7], 4294958976 }
  0x16   :  { %1620 = dma.done.wait [#allocation10], 224  }
  0x17   :  { %1621 = vsyncadd [#allocation10], 4294967072  ;;  %v1633_v0 = vmov 0.0   ;;  %v1368_v1 = vld [vmem:[#allocation6 + $0x38] sm:$0xff]  ;;  %vm99_vm0 = vcmask 982016   ;;  %v1367_v2 = vld [vmem:[#allocation6 + $0x30] sm:$0xff] }
  0x18   :  { %97 = vst [vmem:[#allocation2] sm:$0xff] %v1633_v0  ;;  %171 = vmatpush.bf16.msra.mxu0 %v1368_v1  ;;  %v98_v3 = vld [vmem:[#allocation3] sm:$0xff]  ;;  %v1366_v4 = vld [vmem:[#allocation6 + $0x28] sm:$0xff]  ;;  %v1365_v5 = vld [vmem:[#allocation6 + $0x20] sm:$0xff]  ;;  %s1634_s2 = smov [#allocation12]   ;;  %s1093_s21 = sshll.u32 %s1690_s5, 4  ;;  %s1094_s21 = int_to_ptr.hbm [resolvable:$true] %s1093_s21 }
  0x19   :  { %100 = vst.msk [vmem:[#allocation2] sm:$0xff] %vm99_vm0, %v98_v3  ;;  %v1364_v6 = vld [vmem:[#allocation6 + $0x18] sm:$0xff]  ;;  %v1363_v7 = vld [vmem:[#allocation6 + $0x10] sm:$0xff]  ;;  %v1362_v8 = vld [vmem:[#allocation6 + $0x8] sm:$0xff]  ;;  %s1091_s4 = sshll.u32 %s1634_s2, 4  ;;  %s1092_s4 = int_to_ptr.vmem [resolvable:$true] %s1091_s4 }
  0x1a   :  { %v1361_v9 = vld [vmem:[#allocation6] sm:$0xff]  ;;  %v1376_v12 = vld [vmem:[#allocation6 + $0x78] sm:$0xff]  ;;  %v1375_v13 = vld [vmem:[#allocation6 + $0x70] sm:$0xff] }
  0x1b   :  { %298 = vmatpush.bf16.msra.mxu1 %v1376_v12  ;;  %v1374_v14 = vld [vmem:[#allocation6 + $0x68] sm:$0xff]  ;;  %v1373_v15 = vld [vmem:[#allocation6 + $0x60] sm:$0xff]  ;;  %v1372_v17 = vld [vmem:[#allocation6 + $0x58] sm:$0xff] }
  0x1c   :  { %172 = vmatpush.bf16.msra.mxu0 %v1367_v2  ;;  %v1436_v16 = vld [vmem:[#allocation8] ss:$0 sm:$0xff]  ;;  %v1371_v22 = vld [vmem:[#allocation6 + $0x50] sm:$0xff]  ;;  %v1370_v27 = vld [vmem:[#allocation6 + $0x48] sm:$0xff] }
  0x1d   :  { %v1369_v33 = vld [vmem:[#allocation6 + $0x40] sm:$0xff]  ;;  %v202_v48 = vld [vmem:[#allocation9] sm:$0x1]  ;;  %v215_v52 = vld [vmem:[#allocation11] sm:$0x1] }
  0x1e   :  { %v1384_v61 = vld [vmem:[#allocation6 + $0xb8] sm:$0xff]  ;;  %v1383_v62 = vld [vmem:[#allocation6 + $0xb0] sm:$0xff]  ;;  %v1382_v63 = vld [vmem:[#allocation6 + $0xa8] sm:$0xff] }
  0x1f   :  { %299 = vmatpush.bf16.msra.mxu1 %v1375_v13  ;;  %427 = vmatpush.bf16.msra.mxu2 %v1384_v61  ;;  %v1381_v0 = vld [vmem:[#allocation6 + $0xa0] sm:$0xff]  ;;  %v1380_v2 = vld [vmem:[#allocation6 + $0x98] sm:$0xff]  ;;  %v1378_v12 = vld [vmem:[#allocation6 + $0x88] sm:$0xff] }
  0x20   :  { %173 = vmatpush.bf16.msra.mxu0 %v1366_v4  ;;  %v101_v10 = vld [vmem:[#allocation2] sm:$0xff]  ;;  %v1437_v1 = vld [vmem:[#allocation8 + $0x1] ss:$0 sm:$0xff]  ;;  %v1386_v61 = vld [vmem:[#allocation6 + $0xc8] sm:$0xff] }
  0x21   :  { %v102_v11 = vpack.c.bf16 %v101_v10, %v101_v10 }
  0x23   :  { %300 = vmatpush.bf16.msra.mxu1 %v1374_v14  ;;  %428 = vmatpush.bf16.msra.mxu2 %v1383_v62 }
  0x24   :  { %174 = vmatpush.bf16.msra.mxu0 %v1365_v5 }
  0x27   :  { %301 = vmatpush.bf16.msra.mxu1 %v1373_v15  ;;  %429 = vmatpush.bf16.msra.mxu2 %v1382_v63 }
  0x28   :  { %175 = vmatpush.bf16.msra.mxu0 %v1364_v6 }
  0x2b   :  { %302 = vmatpush.bf16.msra.mxu1 %v1372_v17  ;;  %430 = vmatpush.bf16.msra.mxu2 %v1381_v0 }
  0x2c   :  { %176 = vmatpush.bf16.msra.mxu0 %v1363_v7  ;;  %v1379_v7 = vld [vmem:[#allocation6 + $0x90] sm:$0xff] }
  0x2f   :  { %303 = vmatpush.bf16.msra.mxu1 %v1371_v22  ;;  %431 = vmatpush.bf16.msra.mxu2 %v1380_v2 }
  0x30   :  { %177 = vmatpush.bf16.msra.mxu0 %v1362_v8 }
  0x33   :  { %304 = vmatpush.bf16.msra.mxu1 %v1370_v27  ;;  %432 = vmatpush.bf16.msra.mxu2 %v1379_v7 }
  0x34   :  { %178 = vmatpush.bf16.msra.mxu0 %v1361_v9 }
  0x37   :  { %179 = vmatmul.bf16.vlgmr.msra.gmra.mxu0 %v102_v11  ;;  %305 = vmatpush.bf16.msra.mxu1 %v1369_v33  ;;  %v330_v33 = vld [vmem:[#allocation9 + $0x1] sm:$0x1] }
  0x38   :  { %433 = vmatpush.bf16.msra.mxu2 %v1378_v12 }
  0xb4   :  { %v180_v18 = vpop.f32.mrf.mxu0 }
  0xb5   :  { %v181_v19 = vadd.f32 %v1436_v16, %v180_v18  ;;  %v1377_v18 = vld [vmem:[#allocation6 + $0x80] sm:$0xff] }
  0xb6   :  { %434 = vmatpush.bf16.msra.mxu2 %v1377_v18  ;;  %v459_v18 = vld [vmem:[#allocation9 + $0x2] sm:$0x1] }
  0xb7   :  { %v184_v20 = vrot.slane %v181_v19, 4  ;;  %v190_v21 = vmul.f32 %v181_v19, %v181_v19 }
  0xb9   :  { %v185_v23 = vadd.f32 %v184_v20, %v181_v19  ;;  %v191_v24 = vrot.slane %v190_v21, 4 }
  0xbb   :  { %v186_v25 = vrot.slane %v185_v23, 2  ;;  %v192_v26 = vadd.f32 %v191_v24, %v190_v21 }
  0xbc   :  { %v182_v28 = vpop.f32.mrf.mxu0 }
  0xbd   :  { %v187_v29 = vadd.f32 %v186_v25, %v185_v23  ;;  %v193_v30 = vrot.slane %v192_v26, 2 }
  0xbf   :  { %v188_v31 = vrot.slane %v187_v29, 1  ;;  %v194_v32 = vadd.f32 %v193_v30, %v192_v26 }
  0xc1   :  { %v195_v34 = vrot.slane %v194_v32, 1  ;;  %v189_v35 = vadd.f32 %v188_v31, %v187_v29 }
  0xc3   :  { %v196_v36 = vadd.f32 %v195_v34, %v194_v32  ;;  %v197_v37 = vmul.f32 0.125, %v189_v35 }
  0xc5   :  { %v198_v38 = vmul.f32 0.125, %v196_v36  ;;  %v199_v39 = vmul.f32 %v197_v37, %v197_v37 }
  0xc7   :  { %v200_v40 = vsub.f32 %v198_v38, %v199_v39 }
  0xc9   :  { %v201_v41 = vmax.f32 %v200_v40, 0.0 }
  0xcb   :  { %v203_v42 = vadd.f32 1e-05, %v201_v41 }
  0xcd   :  { %1444 = vrsqrt.f32 %v203_v42  ;;  %vm210_vm2 = vweird.f32 %v203_v42 }
  0xd3   :  { %v1445_v43 = vpop.eup %1444 }
  0xd4   :  { %v205_v44 = vmul.f32 %v1445_v43, %v203_v42  ;;  %vm211_vm1 = vweird.f32 %v1445_v43 }
  0xd5   :  { %vm212_vm3 = vmor %vm210_vm2, %vm211_vm1 }
  0xd6   :  { %v206_v45 = vmul.f32 %v1445_v43, %v205_v44 }
  0xd8   :  { %v207_v46 = vmul.f32 0.5, %v206_v45 }
  0xda   :  { %v208_v47 = vsub.f32 1.5, %v207_v46  ;;  %v1392_v46 = vld [vmem:[#allocation6 + $0xf8] sm:$0xff] }
  0xdb   :  { %556 = vmatpush.bf16.msra.mxu3 %v1392_v46  ;;  %v1394_v46 = vld [vmem:[#allocation6 + $0x108] sm:$0xff] }
  0xdc   :  { %v209_v49 = vmul.f32 %v1445_v43, %v208_v47  ;;  %v1391_v47 = vld [vmem:[#allocation6 + $0xf0] sm:$0xff] }
  0xde   :  { %v213_v50 = vsel %vm212_vm3, %v1445_v43, %v209_v49  ;;  %v1389_v49 = vld [vmem:[#allocation6 + $0xe0] sm:$0xff] }
  0xdf   :  { %v214_v51 = vmul.f32 %v213_v50, %v202_v48  ;;  %557 = vmatpush.bf16.msra.mxu3 %v1391_v47  ;;  %v1390_v48 = vld [vmem:[#allocation6 + $0xe8] sm:$0xff]  ;;  %v1438_v50 = vld [vmem:[#allocation8 + $0x2] ss:$0 sm:$0xff] }
  0xe1   :  { %v216_v53 = vmul.f32 %v214_v51, %v197_v37  ;;  %v219_v54 = vperm.slane %v214_v51, 0  ;;  %v344_v37 = vld [vmem:[#allocation11 + $0x1] sm:$0x1]  ;;  %v1388_v51 = vld [vmem:[#allocation6 + $0xd8] sm:$0xff] }
  0xe3   :  { %v217_v55 = vsub.f32 %v215_v52, %v216_v53  ;;  %v221_v56 = vmul.f32 %v219_v54, %v181_v19  ;;  %558 = vmatpush.bf16.msra.mxu3 %v1390_v48 }
  0xe5   :  { %v223_v57 = vperm.slane %v217_v55, 0 }
  0xe7   :  { %v225_v58 = vadd.f32 %v223_v57, %v221_v56  ;;  %559 = vmatpush.bf16.msra.mxu3 %v1389_v49  ;;  %v1387_v56 = vld [vmem:[#allocation6 + $0xd0] sm:$0xff] }
  0xe9   :  { %1446 = vtanh.f32 %v225_v58 }
  0xeb   :  { %560 = vmatpush.bf16.msra.mxu3 %v1388_v51 }
  0xef   :  { %v1447_v59 = vpop.eup %1446  ;;  %561 = vmatpush.bf16.msra.mxu3 %v1387_v56 }
  0xf0   :  { %v227_v60 = vpack.c.bf16 %v1447_v59, %v1447_v59 }
  0xf2   :  { %306 = vmatmul.bf16.vlgmr.msra.gmra.mxu1 %v227_v60 }
  0xf3   :  { %562 = vmatpush.bf16.msra.mxu3 %v1386_v61 }
 0x16f   :  { %v307_v3 = vpop.f32.mrf.mxu1 }
 0x170   :  { %v308_v4 = vadd.f32 %v1437_v1, %v307_v3  ;;  %v1385_v3 = vld [vmem:[#allocation6 + $0xc0] sm:$0xff] }
 0x171   :  { %563 = vmatpush.bf16.msra.mxu3 %v1385_v3  ;;  %v588_v3 = vld [vmem:[#allocation9 + $0x3] sm:$0x1] }
 0x172   :  { %v311_v5 = vrot.slane %v308_v4, 4  ;;  %v317_v6 = vmul.f32 %v308_v4, %v308_v4 }
 0x174   :  { %v312_v8 = vadd.f32 %v311_v5, %v308_v4  ;;  %v318_v9 = vrot.slane %v317_v6, 4 }
 0x176   :  { %v313_v10 = vrot.slane %v312_v8, 2  ;;  %v319_v11 = vadd.f32 %v318_v9, %v317_v6 }
 0x177   :  { %v309_v13 = vpop.f32.mrf.mxu1 }
 0x178   :  { %v314_v14 = vadd.f32 %v313_v10, %v312_v8  ;;  %v320_v15 = vrot.slane %v319_v11, 2 }
 0x17a   :  { %v315_v16 = vrot.slane %v314_v14, 1  ;;  %v321_v17 = vadd.f32 %v320_v15, %v319_v11 }
 0x17c   :  { %v322_v19 = vrot.slane %v321_v17, 1  ;;  %v316_v20 = vadd.f32 %v315_v16, %v314_v14 }
 0x17e   :  { %v323_v21 = vadd.f32 %v322_v19, %v321_v17  ;;  %v324_v22 = vmul.f32 0.125, %v316_v20 }
 0x180   :  { %v325_v23 = vmul.f32 0.125, %v323_v21  ;;  %v326_v24 = vmul.f32 %v324_v22, %v324_v22 }
 0x182   :  { %v327_v25 = vsub.f32 %v325_v23, %v326_v24 }
 0x184   :  { %v328_v26 = vmax.f32 %v327_v25, 0.0 }
 0x186   :  { %v331_v27 = vadd.f32 1e-05, %v328_v26 }
 0x188   :  { %1448 = vrsqrt.f32 %v331_v27  ;;  %vm338_vm5 = vweird.f32 %v331_v27 }
 0x18e   :  { %v1449_v28 = vpop.eup %1448 }
 0x18f   :  { %v333_v29 = vmul.f32 %v1449_v28, %v331_v27  ;;  %vm339_vm4 = vweird.f32 %v1449_v28 }
 0x190   :  { %vm340_vm6 = vmor %vm338_vm5, %vm339_vm4 }
 0x191   :  { %v334_v30 = vmul.f32 %v1449_v28, %v333_v29 }
 0x193   :  { %v335_v31 = vmul.f32 0.5, %v334_v30 }
 0x195   :  { %v336_v32 = vsub.f32 1.5, %v335_v31  ;;  %v1400_v31 = vld [vmem:[#allocation6 + $0x138] sm:$0xff] }
 0x196   :  { %685 = vmatpush.bf16.msrb.mxu0 %v1400_v31  ;;  %v1402_v31 = vld [vmem:[#allocation6 + $0x148] sm:$0xff] }
 0x197   :  { %v337_v34 = vmul.f32 %v1449_v28, %v336_v32  ;;  %v1399_v32 = vld [vmem:[#allocation6 + $0x130] sm:$0xff] }
 0x199   :  { %v341_v35 = vsel %vm340_vm6, %v1449_v28, %v337_v34  ;;  %v1397_v34 = vld [vmem:[#allocation6 + $0x120] sm:$0xff] }
 0x19a   :  { %v342_v36 = vmul.f32 %v341_v35, %v330_v33  ;;  %686 = vmatpush.bf16.msrb.mxu0 %v1399_v32  ;;  %v1398_v33 = vld [vmem:[#allocation6 + $0x128] sm:$0xff]  ;;  %v1439_v35 = vld [vmem:[#allocation8 + $0x3] ss:$0 sm:$0xff] }
 0x19c   :  { %v345_v38 = vmul.f32 %v342_v36, %v324_v22  ;;  %v348_v39 = vperm.slane %v342_v36, 0  ;;  %v473_v22 = vld [vmem:[#allocation11 + $0x2] sm:$0x1]  ;;  %v1396_v36 = vld [vmem:[#allocation6 + $0x118] sm:$0xff] }
 0x19e   :  { %v346_v40 = vsub.f32 %v344_v37, %v345_v38  ;;  %v350_v41 = vmul.f32 %v348_v39, %v308_v4  ;;  %687 = vmatpush.bf16.msrb.mxu0 %v1398_v33 }
 0x1a0   :  { %v352_v42 = vperm.slane %v346_v40, 0 }
 0x1a2   :  { %v354_v43 = vadd.f32 %v352_v42, %v350_v41  ;;  %688 = vmatpush.bf16.msrb.mxu0 %v1397_v34  ;;  %v1395_v41 = vld [vmem:[#allocation6 + $0x110] sm:$0xff] }
 0x1a4   :  { %1450 = vtanh.f32 %v354_v43 }
 0x1a6   :  { %689 = vmatpush.bf16.msrb.mxu0 %v1396_v36 }
 0x1aa   :  { %v1451_v44 = vpop.eup %1450  ;;  %690 = vmatpush.bf16.msrb.mxu0 %v1395_v41 }
 0x1ab   :  { %v356_v45 = vpack.c.bf16 %v1451_v44, %v1451_v44 }
 0x1ad   :  { %435 = vmatmul.bf16.vlgmr.msra.gmra.mxu2 %v356_v45 }
 0x1ae   :  { %691 = vmatpush.bf16.msrb.mxu0 %v1394_v46 }
 0x230   :  { %v436_v52 = vpop.f32.mrf.mxu2 }
 0x231   :  { %v437_v53 = vadd.f32 %v1438_v50, %v436_v52  ;;  %v1393_v52 = vld [vmem:[#allocation6 + $0x100] sm:$0xff] }
 0x232   :  { %692 = vmatpush.bf16.msrb.mxu0 %v1393_v52  ;;  %v717_v52 = vld [vmem:[#allocation9 + $0x4] sm:$0x1] }
 0x233   :  { %v440_v54 = vrot.slane %v437_v53, 4  ;;  %v446_v55 = vmul.f32 %v437_v53, %v437_v53 }
 0x235   :  { %v441_v57 = vadd.f32 %v440_v54, %v437_v53  ;;  %v447_v58 = vrot.slane %v446_v55, 4 }
 0x237   :  { %v442_v59 = vrot.slane %v441_v57, 2  ;;  %v448_v60 = vadd.f32 %v447_v58, %v446_v55 }
 0x238   :  { %v438_v62 = vpop.f32.mrf.mxu2 }
 0x239   :  { %v443_v63 = vadd.f32 %v442_v59, %v441_v57  ;;  %v449_v0 = vrot.slane %v448_v60, 2 }
 0x23b   :  { %v444_v1 = vrot.slane %v443_v63, 1  ;;  %v450_v2 = vadd.f32 %v449_v0, %v448_v60 }
 0x23d   :  { %v451_v4 = vrot.slane %v450_v2, 1  ;;  %v445_v5 = vadd.f32 %v444_v1, %v443_v63 }
 0x23f   :  { %v452_v6 = vadd.f32 %v451_v4, %v450_v2  ;;  %v453_v7 = vmul.f32 0.125, %v445_v5 }
 0x241   :  { %v454_v8 = vmul.f32 0.125, %v452_v6  ;;  %v455_v9 = vmul.f32 %v453_v7, %v453_v7 }
 0x243   :  { %v456_v10 = vsub.f32 %v454_v8, %v455_v9 }
 0x245   :  { %v457_v11 = vmax.f32 %v456_v10, 0.0 }
 0x247   :  { %v460_v12 = vadd.f32 1e-05, %v457_v11 }
 0x249   :  { %1452 = vrsqrt.f32 %v460_v12  ;;  %vm467_vm8 = vweird.f32 %v460_v12 }
 0x24f   :  { %v1453_v13 = vpop.eup %1452 }
 0x250   :  { %v462_v14 = vmul.f32 %v1453_v13, %v460_v12  ;;  %vm468_vm7 = vweird.f32 %v1453_v13 }
 0x251   :  { %vm469_vm9 = vmor %vm467_vm8, %vm468_vm7 }
 0x252   :  { %v463_v15 = vmul.f32 %v1453_v13, %v462_v14 }
 0x254   :  { %v464_v16 = vmul.f32 0.5, %v463_v15 }
 0x256   :  { %v465_v17 = vsub.f32 1.5, %v464_v16  ;;  %v1408_v16 = vld [vmem:[#allocation6 + $0x178] sm:$0xff] }
 0x257   :  { %814 = vmatpush.bf16.msrb.mxu1 %v1408_v16  ;;  %v1410_v16 = vld [vmem:[#allocation6 + $0x188] sm:$0xff] }
 0x258   :  { %v466_v19 = vmul.f32 %v1453_v13, %v465_v17  ;;  %v1407_v17 = vld [vmem:[#allocation6 + $0x170] sm:$0xff] }
 0x25a   :  { %v470_v20 = vsel %vm469_vm9, %v1453_v13, %v466_v19  ;;  %v1405_v19 = vld [vmem:[#allocation6 + $0x160] sm:$0xff] }
 0x25b   :  { %v471_v21 = vmul.f32 %v470_v20, %v459_v18  ;;  %815 = vmatpush.bf16.msrb.mxu1 %v1407_v17  ;;  %v1406_v18 = vld [vmem:[#allocation6 + $0x168] sm:$0xff]  ;;  %v1440_v20 = vld [vmem:[#allocation8 + $0x4] ss:$0 sm:$0xff] }
 0x25d   :  { %v474_v23 = vmul.f32 %v471_v21, %v453_v7  ;;  %v477_v24 = vperm.slane %v471_v21, 0  ;;  %v602_v7 = vld [vmem:[#allocation11 + $0x3] sm:$0x1]  ;;  %v1404_v21 = vld [vmem:[#allocation6 + $0x158] sm:$0xff] }
 0x25f   :  { %v475_v25 = vsub.f32 %v473_v22, %v474_v23  ;;  %v479_v26 = vmul.f32 %v477_v24, %v437_v53  ;;  %816 = vmatpush.bf16.msrb.mxu1 %v1406_v18 }
 0x261   :  { %v481_v27 = vperm.slane %v475_v25, 0 }
 0x263   :  { %v483_v28 = vadd.f32 %v481_v27, %v479_v26  ;;  %817 = vmatpush.bf16.msrb.mxu1 %v1405_v19  ;;  %v1403_v26 = vld [vmem:[#allocation6 + $0x150] sm:$0xff] }
 0x265   :  { %1454 = vtanh.f32 %v483_v28 }
 0x267   :  { %818 = vmatpush.bf16.msrb.mxu1 %v1404_v21 }
 0x26b   :  { %v1455_v29 = vpop.eup %1454  ;;  %819 = vmatpush.bf16.msrb.mxu1 %v1403_v26 }
 0x26c   :  { %v485_v30 = vpack.c.bf16 %v1455_v29, %v1455_v29 }
 0x26e   :  { %564 = vmatmul.bf16.vlgmr.msra.gmra.mxu3 %v485_v30 }
 0x26f   :  { %820 = vmatpush.bf16.msrb.mxu1 %v1402_v31 }
 0x2f1   :  { %v565_v37 = vpop.f32.mrf.mxu3 }
 0x2f2   :  { %v566_v38 = vadd.f32 %v1439_v35, %v565_v37  ;;  %v1401_v37 = vld [vmem:[#allocation6 + $0x140] sm:$0xff] }
 0x2f3   :  { %821 = vmatpush.bf16.msrb.mxu1 %v1401_v37  ;;  %v846_v37 = vld [vmem:[#allocation9 + $0x5] sm:$0x1] }
 0x2f4   :  { %v569_v39 = vrot.slane %v566_v38, 4  ;;  %v575_v40 = vmul.f32 %v566_v38, %v566_v38 }
 0x2f6   :  { %v570_v42 = vadd.f32 %v569_v39, %v566_v38  ;;  %v576_v43 = vrot.slane %v575_v40, 4 }
 0x2f8   :  { %v571_v44 = vrot.slane %v570_v42, 2  ;;  %v577_v45 = vadd.f32 %v576_v43, %v575_v40 }
 0x2f9   :  { %v567_v47 = vpop.f32.mrf.mxu3 }
 0x2fa   :  { %v572_v48 = vadd.f32 %v571_v44, %v570_v42  ;;  %v578_v49 = vrot.slane %v577_v45, 2 }
 0x2fc   :  { %v573_v50 = vrot.slane %v572_v48, 1  ;;  %v579_v51 = vadd.f32 %v578_v49, %v577_v45 }
 0x2fe   :  { %v574_v53 = vadd.f32 %v573_v50, %v572_v48  ;;  %v580_v54 = vrot.slane %v579_v51, 1 }
 0x300   :  { %v581_v55 = vadd.f32 %v580_v54, %v579_v51  ;;  %v582_v56 = vmul.f32 0.125, %v574_v53 }
 0x302   :  { %v583_v57 = vmul.f32 0.125, %v581_v55  ;;  %v584_v58 = vmul.f32 %v582_v56, %v582_v56 }
 0x304   :  { %v585_v59 = vsub.f32 %v583_v57, %v584_v58 }
 0x306   :  { %v586_v60 = vmax.f32 %v585_v59, 0.0 }
 0x308   :  { %v589_v61 = vadd.f32 1e-05, %v586_v60 }
 0x30a   :  { %1456 = vrsqrt.f32 %v589_v61  ;;  %vm596_vm11 = vweird.f32 %v589_v61 }
 0x310   :  { %v1457_v62 = vpop.eup %1456 }
 0x311   :  { %v591_v63 = vmul.f32 %v1457_v62, %v589_v61  ;;  %vm597_vm10 = vweird.f32 %v1457_v62 }
 0x312   :  { %vm598_vm12 = vmor %vm596_vm11, %vm597_vm10 }
 0x313   :  { %v592_v0 = vmul.f32 %v1457_v62, %v591_v63 }
 0x315   :  { %v593_v1 = vmul.f32 0.5, %v592_v0 }
 0x317   :  { %v594_v2 = vsub.f32 1.5, %v593_v1  ;;  %v1416_v1 = vld [vmem:[#allocation6 + $0x1b8] sm:$0xff] }
 0x318   :  { %943 = vmatpush.bf16.msrb.mxu2 %v1416_v1  ;;  %v1418_v1 = vld [vmem:[#allocation6 + $0x1c8] sm:$0xff] }
 0x319   :  { %v595_v4 = vmul.f32 %v1457_v62, %v594_v2  ;;  %v1415_v2 = vld [vmem:[#allocation6 + $0x1b0] sm:$0xff] }
 0x31b   :  { %v599_v5 = vsel %vm598_vm12, %v1457_v62, %v595_v4  ;;  %v1413_v4 = vld [vmem:[#allocation6 + $0x1a0] sm:$0xff] }
 0x31c   :  { %v600_v6 = vmul.f32 %v599_v5, %v588_v3  ;;  %944 = vmatpush.bf16.msrb.mxu2 %v1415_v2  ;;  %v1414_v3 = vld [vmem:[#allocation6 + $0x1a8] sm:$0xff]  ;;  %v1441_v5 = vld [vmem:[#allocation8 + $0x5] ss:$0 sm:$0xff] }
 0x31e   :  { %v603_v8 = vmul.f32 %v600_v6, %v582_v56  ;;  %v606_v9 = vperm.slane %v600_v6, 0  ;;  %v731_v56 = vld [vmem:[#allocation11 + $0x4] sm:$0x1]  ;;  %v1412_v6 = vld [vmem:[#allocation6 + $0x198] sm:$0xff] }
 0x320   :  { %v604_v10 = vsub.f32 %v602_v7, %v603_v8  ;;  %v608_v11 = vmul.f32 %v606_v9, %v566_v38  ;;  %945 = vmatpush.bf16.msrb.mxu2 %v1414_v3 }
 0x322   :  { %v610_v12 = vperm.slane %v604_v10, 0 }
 0x324   :  { %v612_v13 = vadd.f32 %v610_v12, %v608_v11  ;;  %946 = vmatpush.bf16.msrb.mxu2 %v1413_v4  ;;  %v1411_v11 = vld [vmem:[#allocation6 + $0x190] sm:$0xff] }
 0x326   :  { %1458 = vtanh.f32 %v612_v13 }
 0x328   :  { %947 = vmatpush.bf16.msrb.mxu2 %v1412_v6 }
 0x32c   :  { %v1459_v14 = vpop.eup %1458  ;;  %948 = vmatpush.bf16.msrb.mxu2 %v1411_v11 }
 0x32d   :  { %v614_v15 = vpack.c.bf16 %v1459_v14, %v1459_v14 }
 0x32f   :  { %693 = vmatmul.bf16.vlgmr.msrb.gmra.mxu0 %v614_v15 }
 0x330   :  { %949 = vmatpush.bf16.msrb.mxu2 %v1410_v16 }
 0x3ac   :  { %v694_v22 = vpop.f32.mrf.mxu0 }
 0x3ad   :  { %v695_v23 = vadd.f32 %v1440_v20, %v694_v22  ;;  %v1409_v22 = vld [vmem:[#allocation6 + $0x180] sm:$0xff] }
 0x3ae   :  { %950 = vmatpush.bf16.msrb.mxu2 %v1409_v22  ;;  %v975_v22 = vld [vmem:[#allocation9 + $0x6] sm:$0x1] }
 0x3af   :  { %v698_v24 = vrot.slane %v695_v23, 4  ;;  %v704_v25 = vmul.f32 %v695_v23, %v695_v23 }
 0x3b1   :  { %v699_v27 = vadd.f32 %v698_v24, %v695_v23  ;;  %v705_v28 = vrot.slane %v704_v25, 4 }
 0x3b3   :  { %v700_v29 = vrot.slane %v699_v27, 2  ;;  %v706_v30 = vadd.f32 %v705_v28, %v704_v25 }
 0x3b4   :  { %v696_v32 = vpop.f32.mrf.mxu0 }
 0x3b5   :  { %v701_v33 = vadd.f32 %v700_v29, %v699_v27  ;;  %v707_v34 = vrot.slane %v706_v30, 2 }
 0x3b7   :  { %v702_v35 = vrot.slane %v701_v33, 1  ;;  %v708_v36 = vadd.f32 %v707_v34, %v706_v30 }
 0x3b9   :  { %v703_v38 = vadd.f32 %v702_v35, %v701_v33  ;;  %v709_v39 = vrot.slane %v708_v36, 1 }
 0x3bb   :  { %v710_v40 = vadd.f32 %v709_v39, %v708_v36  ;;  %v711_v41 = vmul.f32 0.125, %v703_v38 }
 0x3bd   :  { %v712_v42 = vmul.f32 0.125, %v710_v40  ;;  %v713_v43 = vmul.f32 %v711_v41, %v711_v41 }
 0x3bf   :  { %v714_v44 = vsub.f32 %v712_v42, %v713_v43 }
 0x3c1   :  { %v715_v45 = vmax.f32 %v714_v44, 0.0 }
 0x3c3   :  { %v718_v46 = vadd.f32 1e-05, %v715_v45 }
 0x3c5   :  { %1460 = vrsqrt.f32 %v718_v46  ;;  %vm725_vm14 = vweird.f32 %v718_v46 }
 0x3cb   :  { %v1461_v47 = vpop.eup %1460 }
 0x3cc   :  { %v720_v48 = vmul.f32 %v1461_v47, %v718_v46  ;;  %vm726_vm13 = vweird.f32 %v1461_v47 }
 0x3cd   :  { %vm727_vm15 = vmor %vm725_vm14, %vm726_vm13 }
 0x3ce   :  { %v721_v49 = vmul.f32 %v1461_v47, %v720_v48 }
 0x3d0   :  { %v722_v50 = vmul.f32 0.5, %v721_v49 }
 0x3d2   :  { %v723_v51 = vsub.f32 1.5, %v722_v50  ;;  %v1424_v50 = vld [vmem:[#allocation6 + $0x1f8] sm:$0xff] }
 0x3d3   :  { %1072 = vmatpush.bf16.msrb.mxu3 %v1424_v50 }
 0x3d4   :  { %v724_v53 = vmul.f32 %v1461_v47, %v723_v51  ;;  %v1423_v51 = vld [vmem:[#allocation6 + $0x1f0] sm:$0xff] }
 0x3d6   :  { %v728_v54 = vsel %vm727_vm15, %v1461_v47, %v724_v53  ;;  %v1421_v53 = vld [vmem:[#allocation6 + $0x1e0] sm:$0xff] }
 0x3d7   :  { %v729_v55 = vmul.f32 %v728_v54, %v717_v52  ;;  %1073 = vmatpush.bf16.msrb.mxu3 %v1423_v51  ;;  %v1422_v52 = vld [vmem:[#allocation6 + $0x1e8] sm:$0xff]  ;;  %v1442_v54 = vld [vmem:[#allocation8 + $0x6] ss:$0 sm:$0xff] }
 0x3d9   :  { %v732_v57 = vmul.f32 %v729_v55, %v711_v41  ;;  %v735_v58 = vperm.slane %v729_v55, 0  ;;  %v860_v41 = vld [vmem:[#allocation11 + $0x5] sm:$0x1]  ;;  %v1420_v55 = vld [vmem:[#allocation6 + $0x1d8] sm:$0xff] }
 0x3db   :  { %v733_v59 = vsub.f32 %v731_v56, %v732_v57  ;;  %v737_v60 = vmul.f32 %v735_v58, %v695_v23  ;;  %1074 = vmatpush.bf16.msrb.mxu3 %v1422_v52 }
 0x3dd   :  { %v739_v61 = vperm.slane %v733_v59, 0 }
 0x3df   :  { %v741_v62 = vadd.f32 %v739_v61, %v737_v60  ;;  %1075 = vmatpush.bf16.msrb.mxu3 %v1421_v53  ;;  %v1419_v60 = vld [vmem:[#allocation6 + $0x1d0] sm:$0xff] }
 0x3e1   :  { %1462 = vtanh.f32 %v741_v62 }
 0x3e3   :  { %1076 = vmatpush.bf16.msrb.mxu3 %v1420_v55 }
 0x3e7   :  { %v1463_v63 = vpop.eup %1462  ;;  %1077 = vmatpush.bf16.msrb.mxu3 %v1419_v60 }
 0x3e8   :  { %v743_v0 = vpack.c.bf16 %v1463_v63, %v1463_v63 }
 0x3ea   :  { %822 = vmatmul.bf16.vlgmr.msrb.gmra.mxu1 %v743_v0 }
 0x3eb   :  { %1078 = vmatpush.bf16.msrb.mxu3 %v1418_v1 }
 0x467   :  { %v823_v7 = vpop.f32.mrf.mxu1 }
 0x468   :  { %v824_v8 = vadd.f32 %v1441_v5, %v823_v7  ;;  %v1417_v7 = vld [vmem:[#allocation6 + $0x1c0] sm:$0xff] }
 0x469   :  { %1079 = vmatpush.bf16.msrb.mxu3 %v1417_v7 }
 0x46a   :  { %v827_v9 = vrot.slane %v824_v8, 4  ;;  %v833_v10 = vmul.f32 %v824_v8, %v824_v8 }
 0x46c   :  { %v828_v12 = vadd.f32 %v827_v9, %v824_v8  ;;  %v834_v13 = vrot.slane %v833_v10, 4 }
 0x46e   :  { %v829_v14 = vrot.slane %v828_v12, 2  ;;  %v835_v15 = vadd.f32 %v834_v13, %v833_v10 }
 0x46f   :  { %v825_v17 = vpop.f32.mrf.mxu1 }
 0x470   :  { %v830_v18 = vadd.f32 %v829_v14, %v828_v12  ;;  %v836_v19 = vrot.slane %v835_v15, 2 }
 0x472   :  { %v831_v20 = vrot.slane %v830_v18, 1  ;;  %v837_v21 = vadd.f32 %v836_v19, %v835_v15 }
 0x474   :  { %v832_v23 = vadd.f32 %v831_v20, %v830_v18  ;;  %v838_v24 = vrot.slane %v837_v21, 1 }
 0x476   :  { %v839_v25 = vadd.f32 %v838_v24, %v837_v21  ;;  %v840_v26 = vmul.f32 0.125, %v832_v23 }
 0x478   :  { %v841_v27 = vmul.f32 0.125, %v839_v25  ;;  %v842_v28 = vmul.f32 %v840_v26, %v840_v26 }
 0x47a   :  { %v843_v29 = vsub.f32 %v841_v27, %v842_v28 }
 0x47c   :  { %v844_v30 = vmax.f32 %v843_v29, 0.0 }
 0x47e   :  { %v847_v31 = vadd.f32 1e-05, %v844_v30 }
 0x480   :  { %1464 = vrsqrt.f32 %v847_v31  ;;  %vm854_vm2 = vweird.f32 %v847_v31 }
 0x486   :  { %v1465_v32 = vpop.eup %1464 }
 0x487   :  { %v849_v33 = vmul.f32 %v1465_v32, %v847_v31  ;;  %vm855_vm1 = vweird.f32 %v1465_v32 }
 0x488   :  { %vm856_vm3 = vmor %vm854_vm2, %vm855_vm1 }
 0x489   :  { %v850_v34 = vmul.f32 %v1465_v32, %v849_v33 }
 0x48b   :  { %v851_v35 = vmul.f32 0.5, %v850_v34 }
 0x48d   :  { %v852_v36 = vsub.f32 1.5, %v851_v35  ;;  %v1443_v35 = vld [vmem:[#allocation8 + $0x7] ss:$0 sm:$0xff] }
 0x48f   :  { %v853_v38 = vmul.f32 %v1465_v32, %v852_v36 }
 0x491   :  { %v857_v39 = vsel %vm856_vm3, %v1465_v32, %v853_v38 }
 0x492   :  { %v858_v40 = vmul.f32 %v857_v39, %v846_v37 }
 0x494   :  { %v861_v42 = vmul.f32 %v858_v40, %v840_v26  ;;  %v864_v43 = vperm.slane %v858_v40, 0  ;;  %v989_v26 = vld [vmem:[#allocation11 + $0x6] sm:$0x1] }
 0x496   :  { %v862_v44 = vsub.f32 %v860_v41, %v861_v42  ;;  %v866_v45 = vmul.f32 %v864_v43, %v824_v8 }
 0x498   :  { %v868_v46 = vperm.slane %v862_v44, 0 }
 0x49a   :  { %v870_v47 = vadd.f32 %v868_v46, %v866_v45 }
 0x49c   :  { %1466 = vtanh.f32 %v870_v47 }
 0x4a2   :  { %v1467_v48 = vpop.eup %1466 }
 0x4a3   :  { %v872_v49 = vpack.c.bf16 %v1467_v48, %v1467_v48 }
 0x4a5   :  { %951 = vmatmul.bf16.vlgmr.msrb.gmra.mxu2 %v872_v49 }
 0x528   :  { %v952_v56 = vpop.f32.mrf.mxu2 }
 0x529   :  { %v953_v57 = vadd.f32 %v1442_v54, %v952_v56 }
 0x52b   :  { %v956_v58 = vrot.slane %v953_v57, 4  ;;  %v962_v59 = vmul.f32 %v953_v57, %v953_v57 }
 0x52d   :  { %v957_v61 = vadd.f32 %v956_v58, %v953_v57  ;;  %v963_v62 = vrot.slane %v962_v59, 4 }
 0x52f   :  { %v958_v63 = vrot.slane %v957_v61, 2  ;;  %v964_v0 = vadd.f32 %v963_v62, %v962_v59 }
 0x530   :  { %v954_v2 = vpop.f32.mrf.mxu2 }
 0x531   :  { %v959_v3 = vadd.f32 %v958_v63, %v957_v61  ;;  %v965_v4 = vrot.slane %v964_v0, 2 }
 0x533   :  { %v960_v5 = vrot.slane %v959_v3, 1  ;;  %v966_v6 = vadd.f32 %v965_v4, %v964_v0 }
 0x535   :  { %v961_v8 = vadd.f32 %v960_v5, %v959_v3  ;;  %v967_v9 = vrot.slane %v966_v6, 1 }
 0x537   :  { %v968_v10 = vadd.f32 %v967_v9, %v966_v6  ;;  %v969_v11 = vmul.f32 0.125, %v961_v8 }
 0x539   :  { %v970_v12 = vmul.f32 0.125, %v968_v10  ;;  %v971_v13 = vmul.f32 %v969_v11, %v969_v11 }
 0x53b   :  { %v972_v14 = vsub.f32 %v970_v12, %v971_v13 }
 0x53d   :  { %v973_v15 = vmax.f32 %v972_v14, 0.0 }
 0x53f   :  { %v976_v16 = vadd.f32 1e-05, %v973_v15 }
 0x541   :  { %1468 = vrsqrt.f32 %v976_v16  ;;  %vm983_vm5 = vweird.f32 %v976_v16 }
 0x547   :  { %v1469_v17 = vpop.eup %1468 }
 0x548   :  { %v978_v18 = vmul.f32 %v1469_v17, %v976_v16  ;;  %vm984_vm4 = vweird.f32 %v1469_v17 }
 0x549   :  { %vm985_vm6 = vmor %vm983_vm5, %vm984_vm4 }
 0x54a   :  { %v979_v19 = vmul.f32 %v1469_v17, %v978_v18 }
 0x54c   :  { %v980_v20 = vmul.f32 0.5, %v979_v19 }
 0x54e   :  { %v981_v21 = vsub.f32 1.5, %v980_v20 }
 0x550   :  { %v982_v23 = vmul.f32 %v1469_v17, %v981_v21 }
 0x552   :  { %v986_v24 = vsel %vm985_vm6, %v1469_v17, %v982_v23 }
 0x553   :  { %v987_v25 = vmul.f32 %v986_v24, %v975_v22 }
 0x555   :  { %v990_v27 = vmul.f32 %v987_v25, %v969_v11  ;;  %v993_v28 = vperm.slane %v987_v25, 0 }
 0x557   :  { %v991_v29 = vsub.f32 %v989_v26, %v990_v27  ;;  %v995_v30 = vmul.f32 %v993_v28, %v953_v57 }
 0x559   :  { %v997_v31 = vperm.slane %v991_v29, 0 }
 0x55b   :  { %v999_v32 = vadd.f32 %v997_v31, %v995_v30 }
 0x55d   :  { %1470 = vtanh.f32 %v999_v32 }
 0x563   :  { %v1471_v33 = vpop.eup %1470 }
 0x564   :  { %v1001_v34 = vpack.c.bf16 %v1471_v33, %v1471_v33 }
 0x566   :  { %1080 = vmatmul.bf16.vlgmr.msrb.gmra.mxu3 %v1001_v34 }
 0x5e9   :  { %v1081_v36 = vpop.f32.mrf.mxu3 }
 0x5ea   :  { %v1082_v37 = vadd.f32 %v1443_v35, %v1081_v36 }
 0x5ec   :  { %1085 = vst.msk [vmem:[#allocation12] sm:$0xff] %vm99_vm0, %v1082_v37 }
 0x5ed   :  { %1096 = dma.vmem_to_hbm [thread:$0]  %s1092_s4, 128, %s1094_s21, [#allocation5]  }
 0x5f1   :  { %v1083_v38 = vpop.f32.mrf.mxu3 }
 0x5f2   :  { %1622 = dma.done.wait [#allocation5], 128  }
 0x5f3   :  { %1623 = vsyncadd [#allocation5], 4294967168 }
 0x5f4   :  { %1101 = vsyncpa [#allocation4], 1 }
 0x5f5   :  { %1102 = vsyncpa [#allocation7], 1 }
 0x5f6   :  { %1103 = vsyncpa [#allocation10], 1 }
 0x5f7   :  { %1104 = vsyncpa [#allocation5], 1 }

</bundles_post_ra>
